<compile_context>
chip_gen: v7x
topology: tpu7x:2x2x1
jax: 0.10.0
libtpu: 0.0.40
codegen_flags: <defaults>
</compile_context>

<pallas_src>
import jax
import jax.numpy as jnp
from jax.experimental import pallas as pl
from jax.experimental.pallas import tpu as pltpu


def _round_up(x, m):
    return (x + m - 1) // m * m


def _choose_tile(B):
    """Batch tile: large enough to amortize the ~0.35us/grid-step overhead,
    small enough for the v5e 16 MiB scoped-VMEM default, and split into >=2
    tiles for large batches so both v7x TensorCores get work."""
    TM_MAX = 4096
    if B <= 8:
        return B
    tiles = pl.cdiv(B, TM_MAX)
    if B >= 1024:
        tiles = max(tiles, 2)
    tm = _round_up(pl.cdiv(B, tiles), 8)
    return min(tm, (B // 8) * 8)   # block may be ragged, but never exceeds B


def mlp_kernel(x_ref, w1_ref, b1_ref, w2_ref, b2_ref, w3_ref, b3_ref, o_ref):
    # x tile: (TM, 30) f32 read once from HBM, cast to bf16 in-register.
    x_bf = x_ref[...].astype(jnp.bfloat16)

    # Layer 1 (MXU, NT form): (35,30)bf16 . (TM,30)bf16^T -> (35, TM) f32.
    h1 = jax.lax.dot_general(
        w1_ref[...], x_bf,
        dimension_numbers=(((1,), (1,)), ((), ())),
        preferred_element_type=jnp.float32)
    h1 = jnp.maximum(h1 + b1_ref[...], 0.0)           # b1 (35,1) lane-broadcast

    # Layer 2 (MXU, NN form): (10,35)bf16 @ (35,TM)bf16 -> (10, TM) f32.
    h2 = jnp.dot(w2_ref[...], h1.astype(jnp.bfloat16),
                 preferred_element_type=jnp.float32)
    h2 = jnp.maximum(h2 + b2_ref[...], 0.0)           # b2 (10,1) lane-broadcast

    # Layer 3 (VPU/XLU): broadcast-multiply + sublane reduce -> (1, TM) f32.
    out = jnp.sum(h2 * w3_ref[...], axis=0, keepdims=True) + b3_ref[...]

    # Lane-dense store of the whole batch tile: (1, 1, TM).
    o_ref[...] = out[None].astype(o_ref.dtype)


def mlp_forward(x, params):
    w1, b1, w2, b2, w3, b3 = params           # PyTorch layout: W is (out, in)
    B, F = x.shape
    H2 = w2.shape[0]                          # 10

    TM = _choose_tile(B)
    G = pl.cdiv(B, TM)

    # Tiny, VMEM-resident operands: pre-cast MXU weights to bf16; reshape w3
    # to a (10,1) column for the VPU layer-3. No HBM-stream cost.
    w1_bf = w1.astype(jnp.bfloat16)
    w2_bf = w2.astype(jnp.bfloat16)
    w3_col = w3.reshape(H2, 1)

    const = lambda a: pl.BlockSpec(a.shape, lambda i: (0,) * a.ndim)

    out = pl.pallas_call(
        mlp_kernel,
        out_shape=jax.ShapeDtypeStruct((G, 1, TM), jnp.float32),
        grid=(G,),
        in_specs=[
            pl.BlockSpec((TM, F), lambda i: (i, 0)),   # x tiled over batch
            const(w1_bf), const(b1),
            const(w2_bf), const(b2),
            const(w3_col), const(b3),
        ],
        out_specs=pl.BlockSpec((1, 1, TM), lambda i: (i, 0, 0)),  # lane-dense
        compiler_params=pltpu.CompilerParams(
            dimension_semantics=("parallel",),
        ),
    )(x, w1_bf, b1, w2_bf, b2, w3_col, b3)

    # (G, 1, TM) -> (B, 1); drop the junk rows of the ragged last tile.
    return out.reshape(-1)[:B][:, None]


def init_params(key):
    """PyTorch nn.Linear-style init: W (out,in), b (out,1), U(+-1/sqrt(fan_in))."""
    def linear(k, fan_in, fan_out):
        kw, kb = jax.random.split(k)
        bound = 1.0 / jnp.sqrt(fan_in)
        w = jax.random.uniform(kw, (fan_out, fan_in), jnp.float32, -bound, bound)
        b = jax.random.uniform(kb, (fan_out, 1), jnp.float32, -bound, bound)
        return w, b

    k1, k2, k3 = jax.random.split(key, 3)
    w1, b1 = linear(k1, 30, 35)
    w2, b2 = linear(k2, 35, 10)
    w3, b3 = linear(k3, 10, 1)
    return (w1, b1, w2, b2, w3, b3)


if __name__ == "__main__":
    key = jax.random.PRNGKey(0)
    kx, kp = jax.random.split(key)

    batch = 8
    x = jax.random.normal(kx, (batch, 30), dtype=jnp.float32)
    params = init_params(kp)

    out = mlp_forward(x, params)
    out = jax.block_until_ready(out)

    # Reference in plain JAX. The kernel uses bf16 operands with f32 MXU
    # accumulation for layers 1/2 (x, w1, w2, h1 are bf16-rounded), which
    # deviates from the pure-f32 PyTorch model at the ~1e-3 relative level;
    # the reference applies the same rounding so this check is tight.
    w1, b1, w2, b2, w3, b3 = params
    xr = x.astype(jnp.bfloat16).astype(jnp.float32)
    w1r = w1.astype(jnp.bfloat16).astype(jnp.float32)
    w2r = w2.astype(jnp.bfloat16).astype(jnp.float32)
    h1 = jnp.maximum(xr @ w1r.T + b1.T, 0.0)
    h1 = h1.astype(jnp.bfloat16).astype(jnp.float32)
    h2 = jnp.maximum(h1 @ w2r.T + b2.T, 0.0)
    ref = h2 @ w3.T + b3.T

    assert out.shape == (batch, 1), out.shape
    assert jnp.allclose(out, ref, atol=2e-3, rtol=2e-3), \
        float(jnp.max(jnp.abs(out - ref)))

    print("KERNEL_OK")
</pallas_src>

<mosaic_0001>
module attributes {stable_mosaic.version = 11 : i64} {
  func.func @mlp_kernel(%arg0: i32, %arg1: memref<8x30xf32, #tpu.memory_space<vmem>>, %arg2: memref<35x30xbf16, #tpu.memory_space<vmem>>, %arg3: memref<35x1xf32, #tpu.memory_space<vmem>>, %arg4: memref<10x35xbf16, #tpu.memory_space<vmem>>, %arg5: memref<10x1xf32, #tpu.memory_space<vmem>>, %arg6: memref<10x1xf32, #tpu.memory_space<vmem>>, %arg7: memref<1x1xf32, #tpu.memory_space<vmem>>, %arg8: memref<1x1x8xf32, #tpu.memory_space<vmem>>) attributes {dimension_semantics = [#tpu.dimension_semantics<parallel>], iteration_bounds = array<i64: 1>, scalar_prefetch = 0 : i64, scratch_operands = 0 : i64, tpu.core_type = #tpu.core_type<tc>, window_params = [{transform_indices = @transform_0, window_bounds = array<i64: 8, 30>}, {pipeline_mode = #tpu.pipeline_mode<synchronous>, transform_indices = @transform_1, window_bounds = array<i64: 35, 30>}, {pipeline_mode = #tpu.pipeline_mode<synchronous>, transform_indices = @transform_2, window_bounds = array<i64: 35, 1>}, {pipeline_mode = #tpu.pipeline_mode<synchronous>, transform_indices = @transform_3, window_bounds = array<i64: 10, 35>}, {pipeline_mode = #tpu.pipeline_mode<synchronous>, transform_indices = @transform_4, window_bounds = array<i64: 10, 1>}, {pipeline_mode = #tpu.pipeline_mode<synchronous>, transform_indices = @transform_5, window_bounds = array<i64: 10, 1>}, {pipeline_mode = #tpu.pipeline_mode<synchronous>, transform_indices = @transform_6, window_bounds = array<i64: 1, 1>}, {transform_indices = @transform_7, window_bounds = array<i64: 1, 1, 8>}]} {
    %c0 = arith.constant 0 : index
    %c0_0 = arith.constant 0 : index
    %0 = vector.load %arg1[%c0, %c0_0] : memref<8x30xf32, #tpu.memory_space<vmem>>, vector<8x30xf32>
    %1 = arith.truncf %0 : vector<8x30xf32> to vector<8x30xbf16>
    %c0_1 = arith.constant 0 : index
    %c0_2 = arith.constant 0 : index
    %2 = vector.load %arg2[%c0_1, %c0_2] : memref<35x30xbf16, #tpu.memory_space<vmem>>, vector<35x30xbf16>
    %cst = arith.constant dense<0.000000e+00> : vector<35x8xf32>
    %3 = tpu.matmul %2, %1, %cst {dimension_numbers = #tpu.dot_dimension_numbers<[1], [1], [0], [0], [0, 0, 1, 0], [], []>} : vector<35x30xbf16>, vector<8x30xbf16>, vector<35x8xf32> -> vector<35x8xf32>
    %c0_3 = arith.constant 0 : index
    %c0_4 = arith.constant 0 : index
    %4 = vector.load %arg3[%c0_3, %c0_4] : memref<35x1xf32, #tpu.memory_space<vmem>>, vector<35x1xf32>
    %5 = vector.broadcast %4 : vector<35x1xf32> to vector<35x8xf32>
    %6 = arith.addf %3, %5 : vector<35x8xf32>
    %cst_5 = arith.constant 0.000000e+00 : f32
    %7 = vector.broadcast %cst_5 : f32 to vector<35x8xf32>
    %8 = arith.maximumf %6, %7 : vector<35x8xf32>
    %c0_6 = arith.constant 0 : index
    %c0_7 = arith.constant 0 : index
    %9 = vector.load %arg4[%c0_6, %c0_7] : memref<10x35xbf16, #tpu.memory_space<vmem>>, vector<10x35xbf16>
    %10 = arith.truncf %8 : vector<35x8xf32> to vector<35x8xbf16>
    %cst_8 = arith.constant dense<0.000000e+00> : vector<10x8xf32>
    %11 = tpu.matmul %9, %10, %cst_8 {dimension_numbers = #tpu.dot_dimension_numbers<[1], [0], [0], [1], [0, 0, 1, 1], [], []>} : vector<10x35xbf16>, vector<35x8xbf16>, vector<10x8xf32> -> vector<10x8xf32>
    %c0_9 = arith.constant 0 : index
    %c0_10 = arith.constant 0 : index
    %12 = vector.load %arg5[%c0_9, %c0_10] : memref<10x1xf32, #tpu.memory_space<vmem>>, vector<10x1xf32>
    %13 = vector.broadcast %12 : vector<10x1xf32> to vector<10x8xf32>
    %14 = arith.addf %11, %13 : vector<10x8xf32>
    %cst_11 = arith.constant 0.000000e+00 : f32
    %15 = vector.broadcast %cst_11 : f32 to vector<10x8xf32>
    %16 = arith.maximumf %14, %15 : vector<10x8xf32>
    %c0_12 = arith.constant 0 : index
    %c0_13 = arith.constant 0 : index
    %17 = vector.load %arg6[%c0_12, %c0_13] : memref<10x1xf32, #tpu.memory_space<vmem>>, vector<10x1xf32>
    %18 = vector.broadcast %17 : vector<10x1xf32> to vector<10x8xf32>
    %19 = arith.mulf %16, %18 : vector<10x8xf32>
    %cst_14 = arith.constant dense<0.000000e+00> : vector<8xf32>
    %20 = vector.multi_reduction <add>, %19, %cst_14 [0] : vector<10x8xf32> to vector<8xf32>
    %21 = vector.shape_cast %20 : vector<8xf32> to vector<1x8xf32>
    %c0_15 = arith.constant 0 : index
    %c0_16 = arith.constant 0 : index
    %22 = vector.load %arg7[%c0_15, %c0_16] : memref<1x1xf32, #tpu.memory_space<vmem>>, vector<1x1xf32>
    %23 = vector.broadcast %22 : vector<1x1xf32> to vector<1x8xf32>
    %24 = arith.addf %21, %23 : vector<1x8xf32>
    %25 = vector.shape_cast %24 : vector<1x8xf32> to vector<1x1x8xf32>
    %c0_17 = arith.constant 0 : index
    %c0_18 = arith.constant 0 : index
    %c0_19 = arith.constant 0 : index
    %26 = vector.load %arg8[%c0_17, %c0_18, %c0_19] : memref<1x1x8xf32, #tpu.memory_space<vmem>>, vector<1x1x8xf32>
    tpu.vector_store %arg8[%c0_17, %c0_18, %c0_19], %25 {strides = array<i32>} : memref<1x1x8xf32, #tpu.memory_space<vmem>>, vector<1x1x8xf32>,
    return
  }
  func.func @transform_0(%arg0: i32) -> (i32, i32) {
    %c0_i32 = arith.constant 0 : i32
    %c0_i32_0 = arith.constant 0 : i32
    return %arg0, %c0_i32 : i32, i32
  }
  func.func @transform_1(%arg0: i32) -> (i32, i32) {
    %c0_i32 = arith.constant 0 : i32
    %c0_i32_0 = arith.constant 0 : i32
    %c0_i32_1 = arith.constant 0 : i32
    return %c0_i32, %c0_i32_0 : i32, i32
  }
  func.func @transform_2(%arg0: i32) -> (i32, i32) {
    %c0_i32 = arith.constant 0 : i32
    %c0_i32_0 = arith.constant 0 : i32
    %c0_i32_1 = arith.constant 0 : i32
    return %c0_i32, %c0_i32_0 : i32, i32
  }
  func.func @transform_3(%arg0: i32) -> (i32, i32) {
    %c0_i32 = arith.constant 0 : i32
    %c0_i32_0 = arith.constant 0 : i32
    %c0_i32_1 = arith.constant 0 : i32
    return %c0_i32, %c0_i32_0 : i32, i32
  }
  func.func @transform_4(%arg0: i32) -> (i32, i32) {
    %c0_i32 = arith.constant 0 : i32
    %c0_i32_0 = arith.constant 0 : i32
    %c0_i32_1 = arith.constant 0 : i32
    return %c0_i32, %c0_i32_0 : i32, i32
  }
  func.func @transform_5(%arg0: i32) -> (i32, i32) {
    %c0_i32 = arith.constant 0 : i32
    %c0_i32_0 = arith.constant 0 : i32
    %c0_i32_1 = arith.constant 0 : i32
    return %c0_i32, %c0_i32_0 : i32, i32
  }
  func.func @transform_6(%arg0: i32) -> (i32, i32) {
    %c0_i32 = arith.constant 0 : i32
    %c0_i32_0 = arith.constant 0 : i32
    %c0_i32_1 = arith.constant 0 : i32
    return %c0_i32, %c0_i32_0 : i32, i32
  }
  func.func @transform_7(%arg0: i32) -> (i32, i32, i32) {
    %c0_i32 = arith.constant 0 : i32
    %c0_i32_0 = arith.constant 0 : i32
    %c0_i32_1 = arith.constant 0 : i32
    return %arg0, %c0_i32, %c0_i32_0 : i32, i32, i32
  }
}

</mosaic_0001>

<bundles_post_ra>
// kernel: tpu_custom_call.1
= control target key start
LH: loop header
LB: loop body
LE: loop exit
PB: predicated region body
PF: predicated region fallthrough
CT: control target
= control target key end

     0   :  { %s475_s0 = inlined_call_operand.vmem [shape: f32[8,30], index: 0, kind: input, shape index: {}]   ;;  %s476_s1 = inlined_call_operand.vmem [shape: bf16[35,30], index: 1, kind: input, shape index: {}]   ;;  %s477_s2 = inlined_call_operand.vmem [shape: f32[35,1], index: 2, kind: input, shape index: {}]   ;;  %s478_s3 = inlined_call_operand.vmem [shape: bf16[10,35], index: 3, kind: input, shape index: {}]   ;;  %s479_s4 = inlined_call_operand.vmem [shape: f32[10,1], index: 4, kind: input, shape index: {}]   ;;  %s480_s5 = inlined_call_operand.vmem [shape: f32[10,1], index: 5, kind: input, shape index: {}]   ;;  %s481_s6 = inlined_call_operand.<no memory space> [shape: f32[1,1], index: 6, kind: input, shape index: {}]   ;;  %s482_s7 = inlined_call_operand.hbm [shape: f32[1,1,8], index: 7, kind: output, shape index: {}]  }
   0x1   :  { %v12_v0 = vstv %s481_s6 }
   0x2   :  { %13 = vst [vmem:[#allocation2] sm:$0x1] %v12_v0 }
   0x3   :  { %v30_v1 = vld [vmem:[%s475_s0] sm:$0xff]  ;;  %vm80_vm0 = vcmask 244736   ;;  %v357_v2 = vmov 0.0   ;;  %vm358_vm1 = vmmov 0   ;;  %v359_v4 = vmov 0   ;;  %v39_v7 = vld [vmem:[%s477_s2 + $0x10] sm:$0xff] }
   0x4   :  { %298 = vmatprep.subr.bf16.mxu0 %v357_v2  ;;  %v31_v3 = vpack.c.bf16 %v30_v1, %v30_v1  ;;  %300 = vmatprep.mubr.msk.bf16.mxu0 %vm358_vm1, %v357_v2  ;;  %v37_v6 = vld [vmem:[%s477_s2] sm:$0xff]  ;;  %v38_v8 = vld [vmem:[%s477_s2 + $0x8] sm:$0xff]  ;;  %v40_v9 = vld [vmem:[%s477_s2 + $0x18] sm:$0xff] }
   0x5   :  { %327 = vset.pattern.permute.xlu0 %v359_v4  ;;  %328 = vset.pattern.permute.xlu1 %v359_v4  ;;  %v329_v10 = vld [vmem:[%s476_s1] sm:$0xff]  }
   0x6   :  { %v91_v5 = vsel %vm80_vm0, %v31_v3, 0  ;;  %312 = vmatprep.subr.bf16.mxu1 %v357_v2  ;;  %318 = vmatprep.mubr.msk.bf16.mxu1 %vm358_vm1, %v357_v2 }
   0x7   :  { %299 = vmatpush3.bf16.xpose.msra.mxu0 %v91_v5  ;;  %44 = vperm.xlu0 %327, %v37_v6  }
   0x8   :  { %54 = vperm.xlu1 %328, %v39_v7  }
   0x9   :  { %14 = vsyncpa [#allocation4], 0  ;;  %v41_v11 = vld [vmem:[%s477_s2 + $0x20] sm:$0x7]  ;;  %v160_v13 = vld [vmem:[%s479_s4 + $0x8] sm:$0x3]  ;;  %v261_v6 = vlaneseq }
   0xa   :  { %v159_v12 = vld [vmem:[%s479_s4] sm:$0xff]  ;;  %v330_v15 = vld [vmem:[%s476_s1 + $0x8] sm:$0xff]   ;;  %v331_v18 = vld [vmem:[%s476_s1 + $0x10] ss:$0 sps:$4 sm:$0x33]   ;;  %vm180_vm2 = vcmask 1040384  }
   0xb   :  { %49 = vperm.xlu0 %327, %v38_v8   ;;  %v230_v14 = vld [vmem:[%s480_s5] sm:$0xff]  ;;  %v231_v16 = vld [vmem:[%s480_s5 + $0x8] sm:$0x3]  ;;  %vm181_vm3 = vcmask 1041408   ;;  %v360_v44 = vmov 65535   ;;  %vm176_vm4 = vcmask 285696  }
   0xc   :  { %59 = vperm.xlu1 %328, %v40_v9   ;;  %v255_v17 = vld [vmem:[#allocation2] sm:$0x1]  ;;  %v182_v45 = vsel %vm180_vm2, 4294967295, %v360_v44  ;;  %vm244_vm5 = vcmask 64512   ;;  %vm246_vm6 = vcmask 58368   ;;  %v262_v9 = vshrl.u32 %v261_v6, 7 }
   0xd   :  { %v183_v50 = vsel %vm181_vm3, %v182_v45, 0  ;;  %v332_v53 = vld [vmem:[%s478_s3] sm:$0x1f]   ;;  %s361_s3 = smov [#allocation3]   ;;  %vm266_vm7 = vcmask 57344  }
   0xe   :  { %301 = vmatmul.mubr.msk.bf16.vlgmr.msra.gmra.mrb[0].mxu0 %vm80_vm0, %v329_v10  ;;  %s274_s25 = sshll.u32 %s361_s3, 4  ;;  %s275_s25 = int_to_ptr.vmem [resolvable:$true] %s274_s25 }
   0xf   :  { %304 = vmatprep.mubr.msk.bf16.mxu0 %vm358_vm1, %v357_v2  ;;  %64 = vperm.xlu0 %327, %v41_v11   ;;  %s333_s26 = scalar_lea.vmem %s275_s25, 16  ;;  %s337_s27 = scalar_lea.vmem %s275_s25, 32 }
  0x10   :  { %163 = vperm.xlu1 %328, %v159_v12   ;;  %v263_v12 = vsub.s32 0, %v262_v9  ;;  %p334_p0 = scmp.ne.s32.totalorder %s275_s25, %s333_s26  ;;  %p338_p1 = scmp.lt.s32.totalorder %s275_s25, %s275_s25 }
  0x11   :  { %p339_p2 = scmp.lt.s32.totalorder %s337_s27, %s333_s26 }
  0x13   :  { %168 = vperm.xlu0 %327, %v160_v13   ;;  %p340_p3 = por %p339_p2, %p338_p1 }
  0x14   :  { %234 = vperm.xlu1 %328, %v230_v14  }
  0x15   :  { %p341_p4 = pnand %p340_p3, %p334_p0 }
  0x16   :  { %305 = vmatmul.mubr.msk.bf16.gmra.mrb[4].mxu0 %vm80_vm0, %v330_v15 }
  0x17   :  { %308 = vmatprep.mubr.msk.bf16.mxu0 %vm358_vm1, %v357_v2  ;;  %239 = vperm.xlu0 %327, %v231_v16  }
  0x18   :  { %258 = vperm.xlu1 %328, %v255_v17  }
  0x1e   :  { %309 = vmatmul.mubr.msk.bf16.gmra.mrb[8].mxu0 %vm80_vm0, %v331_v18 }
  0x86   :  { %v45_v19 = vpop.permute.xlu0 %44 }
  0x87   :  { %v55_v27 = vpop.permute.xlu1 %54 }
  0x8a   :  { %v50_v23 = vpop.permute.xlu0 %49 }
  0x8b   :  { %v60_v34 = vpop.permute.xlu1 %59 }
  0x8e   :  { %v65_v41 = vpop.permute.xlu0 %64 }
  0x8f   :  { %v164_v54 = vpop.permute.xlu1 %163 }
  0x92   :  { %v169_v55 = vpop.permute.xlu0 %168 }
  0x93   :  { %v235_v63 = vpop.permute.xlu1 %234 }
  0x97   :  { %v259_v14 = vpop.permute.xlu1 %258 }
  0x98   :  { %v264_v16 = vrot.slane %v259_v14, %v263_v12 }
  0xe1   :  { %v127_v20 = vpop.f32.mrb[0].mxu0 }
  0xe2   :  { %v128_v21 = vadd.f32 %v127_v20, %v45_v19  ;;  %v302_v22 = vpop.f32.mrb[1].mxu0 }
  0xe3   :  { %v130_v24 = vpop.f32.mrb[2].mxu0 }
  0xe4   :  { %v131_v25 = vadd.f32 %v130_v24, %v50_v23  ;;  %v303_v26 = vpop.f32.mrb[3].mxu0  ;;  %v149_v28 = vmax.f32 %v128_v21, 0.0 }
  0xe6   :  { %v150_v29 = vmax.f32 %v131_v25, 0.0 }
  0xe8   :  { %v156_v30 = vpack.c.bf16 %v150_v29, %v149_v28 }
  0xe9   :  { %v135_v31 = vpop.f32.mrb[4].mxu0 }
  0xea   :  { %v136_v32 = vadd.f32 %v135_v31, %v55_v27  ;;  %v306_v33 = vpop.f32.mrb[5].mxu0  ;;  %313 = vmatpush3.bf16.msra.mxu1 %v156_v30 }
  0xeb   :  { %v138_v35 = vpop.f32.mrb[6].mxu0  ;;  %314 = vmatprep.subr.bf16.mxu1 %v357_v2 }
  0xec   :  { %v139_v36 = vadd.f32 %v138_v35, %v60_v34  ;;  %v307_v37 = vpop.f32.mrb[7].mxu0  ;;  %v151_v38 = vmax.f32 %v136_v32, 0.0 }
  0xee   :  { %v152_v39 = vmax.f32 %v139_v36, 0.0 }
  0xf0   :  { %v157_v40 = vpack.c.bf16 %v152_v39, %v151_v38 }
  0xf1   :  { %v143_v42 = vpop.f32.mrb[8].mxu0 }
  0xf2   :  { %v144_v43 = vadd.f32 %v143_v42, %v65_v41  ;;  %v310_v46 = vpop.f32.mrb[9].mxu0  ;;  %315 = vmatpush3.bf16.msra.mxu1 %v157_v40 }
  0xf3   :  { %v146_v47 = vpop.f32.mrb[10].mxu0  ;;  %316 = vmatprep.subr.bf16.mxu1 %v357_v2  ;;  %v240_v2 = vpop.permute.xlu0 %239 }
  0xf4   :  { %v153_v48 = vmax.f32 %v144_v43, 0.0  ;;  %v311_v49 = vpop.f32.mrb[11].mxu0 }
  0xf6   :  { %v158_v51 = vpack.c.bf16 %v153_v48, %v153_v48 }
  0xf8   :  { %v185_v52 = vand.u32 %v183_v50, %v158_v51 }
  0xfa   :  { %317 = vmatpush3.bf16.msra.mxu1 %v185_v52 }
  0xfd   :  { %319 = vmatmul.mubr.msk.bf16.vlgmr.msra.gmra.mrb[0].mxu1 %vm176_vm4, %v332_v53 }
 0x1d0   :  { %v221_v56 = vpop.f32.mrb[0].mxu1 }
 0x1d1   :  { %v222_v57 = vadd.f32 %v221_v56, %v164_v54  ;;  %v320_v58 = vpop.f32.mrb[1].mxu1 }
 0x1d2   :  { %v224_v59 = vpop.f32.mrb[2].mxu1 }
 0x1d3   :  { %v228_v60 = vmax.f32 %v222_v57, 0.0  ;;  %v225_v61 = vadd.f32 %v224_v59, %v169_v55  ;;  %v321_v62 = vpop.f32.mrb[3].mxu1 }
 0x1d5   :  { %v242_v0 = vmul.f32 %v235_v63, %v228_v60  ;;  %v229_v1 = vmax.f32 %v225_v61, 0.0 }
 0x1d7   :  { %v243_v3 = vmul.f32 %v240_v2, %v229_v1  ;;  %v245_v4 = vsel %vm244_vm5, %v242_v0, 0.0 }
 0x1d9   :  { %v247_v5 = vsel %vm246_vm6, %v243_v3, 0.0 }
 0x1da   :  { %v248_v7 = vadd.f32 %v247_v5, %v245_v4 }
 0x1dc   :  { %v249_v8 = vrot.slane %v248_v7, 4 }
 0x1de   :  { %v250_v10 = vadd.f32 %v249_v8, %v248_v7 }
 0x1e0   :  { %v251_v11 = vrot.slane %v250_v10, 2 }
 0x1e2   :  { %v252_v13 = vadd.f32 %v251_v11, %v250_v10 }
 0x1e4   :  { %v253_v15 = vrot.slane %v252_v13, 1 }
 0x1e6   :  { %v254_v17 = vadd.f32 %v253_v15, %v252_v13 }
 0x1e8   :  { %v265_v18 = vadd.f32 %v264_v16, %v254_v17 }
 0x1ea   :  { %267 = vst.msk [vmem:[#allocation3] sm:$0x1] %vm266_vm7, %v265_v18 }
 0x1eb   :  { %344 = shalt.err (!%p341_p4)
}
 0x1ec   :  { %s345_s29 = scalar_lea.hbm %s482_s7, 16 }
 0x1ed   :  { %p346_p5 = scmp.ne.s32.totalorder %s482_s7, %s345_s29  ;;  %p349_p6 = scmp.lt.u32.totalorder %s345_s29, %s482_s7 }
 0x1ef   :  { %p351_p7 = pnand %p349_p6, %p346_p5 }
 0x1f1   :  { %354 = shalt.err (!%p351_p7)
}
 0x1f2   :  { %277 = dma.vmem_to_hbm [thread:$0]  %s275_s25, 16, %s482_s7, [#allocation4]  }
 0x1f3   :  { %355 = dma.done.wait [#allocation4], 16  }
 0x1f4   :  { %356 = vsyncadd [#allocation4], 4294967280 }
 0x1f5   :  { %281 = vsyncpa [#allocation4], 1 }

</bundles_post_ra>
